<compile_context>
chip_gen: v7x
topology: tpu7x:2x2x1
jax: 0.10.0
libtpu: 0.0.40
codegen_flags: <defaults>
</compile_context>

<pallas_src>
import functools

import jax
import jax.numpy as jnp
from jax.experimental import pallas as pl
from jax.experimental.pallas import tpu as pltpu


def _round_up(x, m):
    return (x + m - 1) // m * m


# ------------------------------ fused kernel ------------------------------- #

def _fcnet_kernel(*refs, layer_cfgs, eps):
    """Single-kernel MLP.

    refs = (x_ref, <per-layer param refs...>, o_ref)
    Per layer: w (d_in_pad, d_out_pad), b (1, d_out_pad), and if that layer uses
    LayerNorm also gamma/beta (1, d_out_pad).

    layer_cfgs: static tuple of (d_out_true, use_ln, use_relu) per layer.
    """
    x_ref = refs[0]
    o_ref = refs[-1]
    p = refs[1:-1]

    x = x_ref[...]
    i = 0
    for (d_out_true, use_ln, use_relu) in layer_cfgs:
        w_ref, b_ref = p[i], p[i + 1]
        i += 2
        if use_ln:
            g_ref, beta_ref = p[i], p[i + 1]
            i += 2

        # MXU matmul in native dtype, f32 accumulator. Pad lanes of x are
        # harmless: the corresponding weight rows are zero.
        xm = x if x.dtype == w_ref.dtype else x.astype(w_ref.dtype)
        y = jnp.dot(xm, w_ref[...], preferred_element_type=jnp.float32)
        y = y + b_ref[...].astype(jnp.float32)

        if use_ln:
            d_pad = y.shape[-1]
            inv_n = 1.0 / float(d_out_true)
            # Pad output lanes of y are exactly zero (zero weight cols + zero
            # bias pad), so the unmasked sum already equals the true-lane sum.
            mean = jnp.sum(y, axis=-1, keepdims=True) * inv_n
            centered = y - mean
            if d_pad != d_out_true:
                lane = jax.lax.broadcasted_iota(jnp.int32, y.shape, 1)
                cmask = jnp.where(lane < d_out_true, centered, 0.0)
            else:
                cmask = centered
            var = jnp.sum(cmask * cmask, axis=-1, keepdims=True) * inv_n
            y = centered * jax.lax.rsqrt(var + eps)
            y = y * g_ref[...].astype(jnp.float32) + beta_ref[...].astype(jnp.float32)

        if use_relu:
            y = jnp.maximum(y, 0.0)

        x = y  # stays in f32 / VMEM; cast back to param dtype at next matmul

    o_ref[...] = x.astype(o_ref.dtype)


# ------------------------------ forward wrapper ----------------------------- #

def fcnet_forward(x, params, *, last_nonlinear=False, layer_norm=False, eps=1e-5):
    """Matches FCNet.forward. x: (B, dim_list[0]). Empty params -> identity."""
    if len(params) == 0:
        return x  # nn.Identity()

    B, d_in = x.shape
    n_layers = len(params)
    dtype = x.dtype

    # --- batch tiling: one big lane/sublane-aligned tile, full batch if small --
    B_pad = _round_up(max(B, 8), 8)
    if B_pad <= 256:
        block_b = B_pad
    else:
        block_b = 256
        B_pad = _round_up(B, block_b)

    # --- pad feature dims to multiples of 128 (lane width) with zeros ----------
    d_in_pad = _round_up(d_in, 128)
    x_p = jnp.zeros((B_pad, d_in_pad), dtype).at[:B, :d_in].set(x)

    flat_args = [x_p]
    in_specs = [pl.BlockSpec((block_b, d_in_pad), lambda i: (i, 0))]
    layer_cfgs = []
    flops = 0
    cur_in_pad = d_in_pad
    for idx, (w, b, gamma, beta) in enumerate(params):
        di, do = w.shape
        do_pad = _round_up(do, 128)
        is_last = idx == n_layers - 1
        drop_tail = is_last and not last_nonlinear
        use_ln = layer_norm and not drop_tail
        use_relu = not drop_tail

        w_p = jnp.zeros((cur_in_pad, do_pad), w.dtype).at[:di, :do].set(w)
        b_p = jnp.zeros((1, do_pad), b.dtype).at[0, :do].set(b.reshape(-1))
        flat_args += [w_p, b_p]
        in_specs += [
            pl.BlockSpec((cur_in_pad, do_pad), lambda i: (0, 0)),
            pl.BlockSpec((1, do_pad), lambda i: (0, 0)),
        ]
        if use_ln:
            g_p = jnp.zeros((1, do_pad), gamma.dtype).at[0, :do].set(gamma.reshape(-1))
            bt_p = jnp.zeros((1, do_pad), beta.dtype).at[0, :do].set(beta.reshape(-1))
            flat_args += [g_p, bt_p]
            in_specs += [
                pl.BlockSpec((1, do_pad), lambda i: (0, 0)),
                pl.BlockSpec((1, do_pad), lambda i: (0, 0)),
            ]
        layer_cfgs.append((do, use_ln, use_relu))
        flops += 2 * B_pad * cur_in_pad * do_pad
        cur_in_pad = do_pad

    d_out_last = params[-1][0].shape[1]
    d_out_pad = cur_in_pad
    grid = (B_pad // block_b,)
    out_shape = jax.ShapeDtypeStruct((B_pad, d_out_pad), dtype)
    out_spec = pl.BlockSpec((block_b, d_out_pad), lambda i: (i, 0))

    itemsize = jnp.dtype(dtype).itemsize
    bytes_accessed = sum(int(a.size) * a.dtype.itemsize for a in flat_args)
    bytes_accessed += B_pad * d_out_pad * itemsize
    cost = pl.CostEstimate(flops=flops, transcendentals=0,
                           bytes_accessed=bytes_accessed)

    # Rough VMEM need: double-buffered x/out tiles + all resident params.
    vmem_est = 2 * (block_b * d_in_pad + block_b * d_out_pad) * itemsize
    vmem_est += 2 * sum(int(a.size) * a.dtype.itemsize for a in flat_args[1:])
    cp_kwargs = dict(dimension_semantics=("parallel",))
    if vmem_est > (32 << 20):
        # TODO(synk): for very large hidden dims (v7x has only 64 MiB VMEM/TC)
        # add a K grid axis + f32 accumulator instead of keeping the full
        # weights resident; not needed at these shapes.
        cp_kwargs["vmem_limit_bytes"] = int(min(vmem_est * 5 // 4, 60 << 20))

    kernel = functools.partial(_fcnet_kernel,
                               layer_cfgs=tuple(layer_cfgs), eps=eps)
    out_p = pl.pallas_call(
        kernel,
        out_shape=out_shape,
        grid=grid,
        in_specs=in_specs,
        out_specs=out_spec,
        compiler_params=pltpu.CompilerParams(**cp_kwargs),
        cost_estimate=cost,
    )(*flat_args)
    return out_p[:B, :d_out_last]


# ------------------------------- params / ref ------------------------------- #

def init_fcnet_params(key, dim_list, layer_norm=False, dtype=jnp.float32):
    """PyTorch-style uniform(+-1/sqrt(fan_in)) init; weights stored (d_in, d_out)."""
    params = []
    for i in range(len(dim_list) - 1):
        d_in, d_out = dim_list[i], dim_list[i + 1]
        key, kw, kb = jax.random.split(key, 3)
        bound = 1.0 / (d_in ** 0.5)
        w = jax.random.uniform(kw, (d_in, d_out), dtype, -bound, bound)
        b = jax.random.uniform(kb, (d_out,), dtype, -bound, bound)
        if layer_norm:
            params.append((w, b, jnp.ones((d_out,), dtype), jnp.zeros((d_out,), dtype)))
        else:
            params.append((w, b, None, None))
    return params


def fcnet_reference(x, params, *, last_nonlinear=False, layer_norm=False, eps=1e-5):
    """Pure-JAX reference matching the torch module."""
    n = len(params)
    if n == 0:
        return x
    out = x
    for idx, (w, b, gamma, beta) in enumerate(params):
        drop_tail = (idx == n - 1) and not last_nonlinear
        out = out @ w + b
        if not drop_tail:
            if layer_norm:
                mu = jnp.mean(out, axis=-1, keepdims=True)
                var = jnp.mean((out - mu) ** 2, axis=-1, keepdims=True)
                out = (out - mu) * jax.lax.rsqrt(var + eps) * gamma + beta
            out = jnp.maximum(out, 0.0)
    return out


# ---------------------------------- main ------------------------------------ #

if __name__ == "__main__":
    key = jax.random.PRNGKey(0)

    B = 37                     # ragged batch -> exercises zero-padding of B
    dim_list = [32, 64, 16]    # small dims -> exercises 128-lane padding + masked LN

    for layer_norm, last_nonlinear in [(True, False), (False, False), (True, True)]:
        key, kx, kp = jax.random.split(key, 3)
        x = jax.random.normal(kx, (B, dim_list[0]), jnp.float32)
        params = init_fcnet_params(kp, dim_list, layer_norm=layer_norm)

        out = fcnet_forward(x, params, last_nonlinear=last_nonlinear,
                            layer_norm=layer_norm)
        out = jax.block_until_ready(out)

        ref = fcnet_reference(x, params, last_nonlinear=last_nonlinear,
                              layer_norm=layer_norm)
        assert out.shape == (B, dim_list[-1])
        assert jnp.allclose(out, ref, atol=1e-4, rtol=1e-4), (
            f"mismatch ln={layer_norm} last_nl={last_nonlinear} "
            f"max_err={float(jnp.max(jnp.abs(out - ref)))}")

    print("KERNEL_OK")
</pallas_src>

<mosaic_0001>
module attributes {stable_mosaic.version = 11 : i64} {
  func.func @_fcnet_kernel(%arg0: i32, %arg1: memref<40x128xf32, #tpu.memory_space<vmem>>, %arg2: memref<128x128xf32, #tpu.memory_space<vmem>>, %arg3: memref<1x128xf32, #tpu.memory_space<vmem>>, %arg4: memref<1x128xf32, #tpu.memory_space<vmem>>, %arg5: memref<1x128xf32, #tpu.memory_space<vmem>>, %arg6: memref<128x128xf32, #tpu.memory_space<vmem>>, %arg7: memref<1x128xf32, #tpu.memory_space<vmem>>, %arg8: memref<40x128xf32, #tpu.memory_space<vmem>>) attributes {dimension_semantics = [#tpu.dimension_semantics<parallel>], iteration_bounds = array<i64: 1>, scalar_prefetch = 0 : i64, scratch_operands = 0 : i64, tpu.core_type = #tpu.core_type<tc>, window_params = [{transform_indices = @transform_0, window_bounds = array<i64: 40, 128>}, {pipeline_mode = #tpu.pipeline_mode<synchronous>, transform_indices = @transform_1, window_bounds = array<i64: 128, 128>}, {pipeline_mode = #tpu.pipeline_mode<synchronous>, transform_indices = @transform_2, window_bounds = array<i64: 1, 128>}, {pipeline_mode = #tpu.pipeline_mode<synchronous>, transform_indices = @transform_3, window_bounds = array<i64: 1, 128>}, {pipeline_mode = #tpu.pipeline_mode<synchronous>, transform_indices = @transform_4, window_bounds = array<i64: 1, 128>}, {pipeline_mode = #tpu.pipeline_mode<synchronous>, transform_indices = @transform_5, window_bounds = array<i64: 128, 128>}, {pipeline_mode = #tpu.pipeline_mode<synchronous>, transform_indices = @transform_6, window_bounds = array<i64: 1, 128>}, {transform_indices = @transform_7, window_bounds = array<i64: 40, 128>}]} {
    %c0 = arith.constant 0 : index
    %c0_0 = arith.constant 0 : index
    %0 = vector.load %arg1[%c0, %c0_0] : memref<40x128xf32, #tpu.memory_space<vmem>>, vector<40x128xf32>
    %c0_1 = arith.constant 0 : index
    %c0_2 = arith.constant 0 : index
    %1 = vector.load %arg2[%c0_1, %c0_2] : memref<128x128xf32, #tpu.memory_space<vmem>>, vector<128x128xf32>
    %cst = arith.constant dense<0.000000e+00> : vector<40x128xf32>
    %2 = tpu.matmul %0, %1, %cst {dimension_numbers = #tpu.dot_dimension_numbers<[1], [0], [0], [1], [0, 0, 1, 1], [], []>} : vector<40x128xf32>, vector<128x128xf32>, vector<40x128xf32> -> vector<40x128xf32>
    %c0_3 = arith.constant 0 : index
    %c0_4 = arith.constant 0 : index
    %3 = vector.load %arg3[%c0_3, %c0_4] : memref<1x128xf32, #tpu.memory_space<vmem>>, vector<1x128xf32>
    %4 = vector.broadcast %3 : vector<1x128xf32> to vector<40x128xf32>
    %5 = arith.addf %2, %4 : vector<40x128xf32>
    %cst_5 = arith.constant dense<0.000000e+00> : vector<40xf32>
    %6 = vector.multi_reduction <add>, %5, %cst_5 [1] : vector<40x128xf32> to vector<40xf32>
    %7 = vector.shape_cast %6 : vector<40xf32> to vector<40x1xf32>
    %cst_6 = arith.constant 1.562500e-02 : f32
    %8 = vector.broadcast %cst_6 : f32 to vector<40x1xf32>
    %9 = arith.mulf %7, %8 : vector<40x1xf32>
    %10 = vector.broadcast %9 : vector<40x1xf32> to vector<40x128xf32>
    %11 = arith.subf %5, %10 : vector<40x128xf32>
    %12 = tpu.iota {dimensions = array<i32: 1>} : vector<40x128xi32>
    %c64_i32 = arith.constant 64 : i32
    %13 = vector.broadcast %c64_i32 : i32 to vector<40x128xi32>
    %14 = arith.cmpi slt, %12, %13 : vector<40x128xi32>
    %cst_7 = arith.constant 0.000000e+00 : f32
    %15 = vector.broadcast %cst_7 : f32 to vector<40x128xf32>
    %16 = arith.select %14, %11, %15 : vector<40x128xi1>, vector<40x128xf32>
    %17 = arith.mulf %16, %16 : vector<40x128xf32>
    %cst_8 = arith.constant dense<0.000000e+00> : vector<40xf32>
    %18 = vector.multi_reduction <add>, %17, %cst_8 [1] : vector<40x128xf32> to vector<40xf32>
    %19 = vector.shape_cast %18 : vector<40xf32> to vector<40x1xf32>
    %cst_9 = arith.constant 1.562500e-02 : f32
    %20 = vector.broadcast %cst_9 : f32 to vector<40x1xf32>
    %21 = arith.mulf %19, %20 : vector<40x1xf32>
    %cst_10 = arith.constant 9.99999974E-6 : f32
    %22 = vector.broadcast %cst_10 : f32 to vector<40x1xf32>
    %23 = arith.addf %21, %22 : vector<40x1xf32>
    %24 = math.rsqrt %23 : vector<40x1xf32>
    %25 = vector.broadcast %24 : vector<40x1xf32> to vector<40x128xf32>
    %26 = arith.mulf %11, %25 : vector<40x128xf32>
    %c0_11 = arith.constant 0 : index
    %c0_12 = arith.constant 0 : index
    %27 = vector.load %arg4[%c0_11, %c0_12] : memref<1x128xf32, #tpu.memory_space<vmem>>, vector<1x128xf32>
    %28 = vector.broadcast %27 : vector<1x128xf32> to vector<40x128xf32>
    %29 = arith.mulf %26, %28 : vector<40x128xf32>
    %c0_13 = arith.constant 0 : index
    %c0_14 = arith.constant 0 : index
    %30 = vector.load %arg5[%c0_13, %c0_14] : memref<1x128xf32, #tpu.memory_space<vmem>>, vector<1x128xf32>
    %31 = vector.broadcast %30 : vector<1x128xf32> to vector<40x128xf32>
    %32 = arith.addf %29, %31 : vector<40x128xf32>
    %cst_15 = arith.constant 0.000000e+00 : f32
    %33 = vector.broadcast %cst_15 : f32 to vector<40x128xf32>
    %34 = arith.maximumf %32, %33 : vector<40x128xf32>
    %c0_16 = arith.constant 0 : index
    %c0_17 = arith.constant 0 : index
    %35 = vector.load %arg6[%c0_16, %c0_17] : memref<128x128xf32, #tpu.memory_space<vmem>>, vector<128x128xf32>
    %cst_18 = arith.constant dense<0.000000e+00> : vector<40x128xf32>
    %36 = tpu.matmul %34, %35, %cst_18 {dimension_numbers = #tpu.dot_dimension_numbers<[1], [0], [0], [1], [0, 0, 1, 1], [], []>} : vector<40x128xf32>, vector<128x128xf32>, vector<40x128xf32> -> vector<40x128xf32>
    %c0_19 = arith.constant 0 : index
    %c0_20 = arith.constant 0 : index
    %37 = vector.load %arg7[%c0_19, %c0_20] : memref<1x128xf32, #tpu.memory_space<vmem>>, vector<1x128xf32>
    %38 = vector.broadcast %37 : vector<1x128xf32> to vector<40x128xf32>
    %39 = arith.addf %36, %38 : vector<40x128xf32>
    %c0_21 = arith.constant 0 : index
    %c0_22 = arith.constant 0 : index
    %40 = vector.load %arg8[%c0_21, %c0_22] : memref<40x128xf32, #tpu.memory_space<vmem>>, vector<40x128xf32>
    tpu.vector_store %arg8[%c0_21, %c0_22], %39 {strides = array<i32>} : memref<40x128xf32, #tpu.memory_space<vmem>>, vector<40x128xf32>,
    return
  }
  func.func @transform_0(%arg0: i32) -> (i32, i32) {
    %c0_i32 = arith.constant 0 : i32
    %c0_i32_0 = arith.constant 0 : i32
    return %arg0, %c0_i32 : i32, i32
  }
  func.func @transform_1(%arg0: i32) -> (i32, i32) {
    %c0_i32 = arith.constant 0 : i32
    %c0_i32_0 = arith.constant 0 : i32
    %c0_i32_1 = arith.constant 0 : i32
    return %c0_i32, %c0_i32_0 : i32, i32
  }
  func.func @transform_2(%arg0: i32) -> (i32, i32) {
    %c0_i32 = arith.constant 0 : i32
    %c0_i32_0 = arith.constant 0 : i32
    %c0_i32_1 = arith.constant 0 : i32
    return %c0_i32, %c0_i32_0 : i32, i32
  }
  func.func @transform_3(%arg0: i32) -> (i32, i32) {
    %c0_i32 = arith.constant 0 : i32
    %c0_i32_0 = arith.constant 0 : i32
    %c0_i32_1 = arith.constant 0 : i32
    return %c0_i32, %c0_i32_0 : i32, i32
  }
  func.func @transform_4(%arg0: i32) -> (i32, i32) {
    %c0_i32 = arith.constant 0 : i32
    %c0_i32_0 = arith.constant 0 : i32
    %c0_i32_1 = arith.constant 0 : i32
    return %c0_i32, %c0_i32_0 : i32, i32
  }
  func.func @transform_5(%arg0: i32) -> (i32, i32) {
    %c0_i32 = arith.constant 0 : i32
    %c0_i32_0 = arith.constant 0 : i32
    %c0_i32_1 = arith.constant 0 : i32
    return %c0_i32, %c0_i32_0 : i32, i32
  }
  func.func @transform_6(%arg0: i32) -> (i32, i32) {
    %c0_i32 = arith.constant 0 : i32
    %c0_i32_0 = arith.constant 0 : i32
    %c0_i32_1 = arith.constant 0 : i32
    return %c0_i32, %c0_i32_0 : i32, i32
  }
  func.func @transform_7(%arg0: i32) -> (i32, i32) {
    %c0_i32 = arith.constant 0 : i32
    %c0_i32_0 = arith.constant 0 : i32
    return %arg0, %c0_i32 : i32, i32
  }
}

</mosaic_0001>

<bundles_post_ra>
// kernel: tpu_custom_call.1
= control target key start
LH: loop header
LB: loop body
LE: loop exit
PB: predicated region body
PF: predicated region fallthrough
CT: control target
= control target key end

     0   :  { %12 = vsyncpa [#allocation3], 0  ;;  %s904_s0 = inlined_call_operand.hbm [shape: f32[40,128], index: 0, kind: input, shape index: {}]   ;;  %s905_s1 = inlined_call_operand.hbm [shape: f32[128,128], index: 1, kind: input, shape index: {}]   ;;  %s906_s2 = inlined_call_operand.vmem [shape: f32[1,128], index: 2, kind: input, shape index: {}]   ;;  %s907_s3 = inlined_call_operand.vmem [shape: f32[1,128], index: 3, kind: input, shape index: {}]   ;;  %s908_s4 = inlined_call_operand.vmem [shape: f32[1,128], index: 4, kind: input, shape index: {}]   ;;  %s909_s5 = inlined_call_operand.hbm [shape: f32[128,128], index: 5, kind: input, shape index: {}]   ;;  %s910_s6 = inlined_call_operand.vmem [shape: f32[1,128], index: 6, kind: input, shape index: {}]   ;;  %s911_s7 = inlined_call_operand.hbm [shape: f32[40,128], index: 7, kind: output, shape index: {}]  }
   0x1   :  { %13 = vsyncpa [#allocation6], 0 }
   0x2   :  { %14 = vsyncpa [#allocation4], 0  ;;  %s715_s24 = smov [#allocation5]   ;;  %s716_s26 = smov [#allocation2]  }
   0x3   :  { %s32_s25 = sshll.u32 %s715_s24, 4  ;;  %s20_s27 = sshll.u32 %s716_s26, 4  ;;  %s33_s25 = int_to_ptr.vmem [resolvable:$true] %s32_s25  ;;  %s764_s27 = int_to_ptr.vmem [resolvable:$true] %s20_s27 }
   0x4   :  { %s621_s30 = scalar_lea.hbm %s905_s1, 2048 }
   0x5   :  { %p622_p0 = scmp.ne.s32.totalorder %s905_s1, %s621_s30  ;;  %p625_p1 = scmp.lt.u32.totalorder %s621_s30, %s905_s1 }
   0x7   :  { %p627_p2 = pnand %p625_p1, %p622_p0 }
   0x9   :  { %630 = shalt.err (!%p627_p2)
}
   0xa   :  { %s631_s12 = scalar_lea.vmem %s33_s25, 2048  ;;  %p636_p4 = scmp.lt.s32.totalorder %s33_s25, %s33_s25 }
   0xb   :  { %p632_p3 = scmp.ne.s32.totalorder %s33_s25, %s631_s12  ;;  %p637_p5 = scmp.lt.s32.totalorder %s631_s12, %s631_s12 }
   0xd   :  { %p638_p6 = por %p637_p5, %p636_p4 }
   0xf   :  { %p639_p7 = pnand %p638_p6, %p632_p3 }
  0x11   :  { %642 = shalt.err (!%p639_p7)
}
  0x12   :  { %s717_s13 = smov 128   ;;  %s718_s14 = smov 8  }
  0x13   :  { %38 = dma.hbm_to_vmem [thread:$0]  %s905_s1, 2048, %s33_s25, [#allocation6], %s717_s13, %s717_s13, %s718_s14  }
  0x14   :  { %s643_s19 = scalar_lea.hbm %s904_s0, 640 }
  0x15   :  { %p644_p8 = scmp.ne.s32.totalorder %s904_s0, %s643_s19  ;;  %p647_p9 = scmp.lt.u32.totalorder %s643_s19, %s904_s0 }
  0x17   :  { %p649_p10 = pnand %p647_p9, %p644_p8 }
  0x19   :  { %652 = shalt.err (!%p649_p10)
}
  0x1a   :  { %s653_s24 = scalar_lea.vmem %s764_s27, 640  ;;  %p658_p12 = scmp.lt.s32.totalorder %s764_s27, %s764_s27 }
  0x1b   :  { %p654_p11 = scmp.ne.s32.totalorder %s764_s27, %s653_s24  ;;  %p659_p13 = scmp.lt.s32.totalorder %s653_s24, %s653_s24 }
  0x1d   :  { %p660_p0 = por %p659_p13, %p658_p12 }
  0x1f   :  { %p661_p1 = pnand %p660_p0, %p654_p11 }
  0x21   :  { %664 = shalt.err (!%p661_p1)
}
  0x22   :  { %26 = dma.hbm_to_vmem [thread:$0]  %s904_s0, 640, %s764_s27, [#allocation3], %s717_s13, %s717_s13, %s718_s14  }
  0x23   :  { %s719_s26 = smov [#allocation7]   ;;  %s665_s8 = scalar_lea.hbm %s909_s5, 2048 }
  0x24   :  { %s50_s28 = sshll.u32 %s719_s26, 4  ;;  %p666_p2 = scmp.ne.s32.totalorder %s909_s5, %s665_s8  ;;  %s51_s28 = int_to_ptr.vmem [resolvable:$true] %s50_s28 }
  0x25   :  { %p669_p3 = scmp.lt.u32.totalorder %s665_s8, %s909_s5 }
  0x27   :  { %p671_p4 = pnand %p669_p3, %p666_p2 }
  0x29   :  { %674 = shalt.err (!%p671_p4)
}
  0x2a   :  { %s675_s15 = scalar_lea.vmem %s51_s28, 2048  ;;  %p680_p6 = scmp.lt.s32.totalorder %s51_s28, %s51_s28 }
  0x2b   :  { %p676_p5 = scmp.ne.s32.totalorder %s51_s28, %s675_s15  ;;  %p681_p7 = scmp.lt.s32.totalorder %s675_s15, %s675_s15 }
  0x2d   :  { %p682_p8 = por %p681_p7, %p680_p6 }
  0x2f   :  { %p683_p9 = pnand %p682_p8, %p676_p5 }
  0x31   :  { %686 = shalt.err (!%p683_p9)
}
  0x32   :  { %56 = dma.hbm_to_vmem [thread:$0]  %s909_s5, 2048, %s51_s28, [#allocation6], %s717_s13, %s717_s13, %s718_s14  }
  0x33   :  { %709 = dma.done.wait [#allocation3], 640  }
  0x34   :  { %710 = vsyncadd [#allocation3], 4294966656 }
  0x35   :  { %711 = dma.done.wait [#allocation6], 4096  }
  0x36   :  { %712 = vsyncadd [#allocation6], 4294963200  ;;  %v720_v0 = vmov 0.0|0.0   ;;  %vm721_vm0 = vmmov 0   ;;  %v722_v1 = vmov 0.0   ;;  %v73_v2 = vld [vmem:[#allocation5] sm:$0xff]  ;;  %v206_v53 = vlaneseq }
  0x37   :  { %554 = vmatprep.subr.bf16.mxu0 %v720_v0  ;;  %492 = vmatprep.mubr.msk.f32.mxu0 %vm721_vm0, %v722_v1  ;;  %v74_v3 = vld [vmem:[#allocation5 + $0x8] sm:$0xff]  ;;  %v75_v4 = vld [vmem:[#allocation5 + $0x10] sm:$0xff]  ;;  %v76_v6 = vld [vmem:[#allocation5 + $0x18] sm:$0xff]  ;;  %s723_s20 = smov [#allocation8]  }
  0x38   :  { %578 = vmatprep.subr.bf16.mxu1 %v720_v0  ;;  %539 = vmatprep.mubr.msk.f32.mxu1 %vm721_vm0, %v722_v1  ;;  %v555_v5 = vpack.c.bf16 %v74_v3, %v73_v2  ;;  %v558_v7 = vpack.c.bf16 %v76_v6, %v75_v4  ;;  %v77_v8 = vld [vmem:[#allocation5 + $0x20] sm:$0xff]  ;;  %v78_v9 = vld [vmem:[#allocation5 + $0x28] sm:$0xff]  ;;  %v79_v11 = vld [vmem:[#allocation5 + $0x30] sm:$0xff]  ;;  %v207_v54 = vand.u32 127, %v206_v53  ;;  %s401_s21 = sshll.u32 %s723_s20, 4  ;;  %s402_s21 = int_to_ptr.vmem [resolvable:$true] %s401_s21 }
  0x39   :  { %v561_v10 = vpack.c.bf16 %v78_v9, %v77_v8  ;;  %v80_v12 = vld [vmem:[#allocation5 + $0x38] sm:$0xff]  ;;  %v81_v14 = vld [vmem:[#allocation5 + $0x40] sm:$0xff]  ;;  %v82_v15 = vld [vmem:[#allocation5 + $0x48] sm:$0xff]  ;;  %p692_p11 = scmp.lt.s32.totalorder %s402_s21, %s402_s21 }
  0x3a   :  { %556 = vmatpush3.bf16.msra.mxu0 %v555_v5  ;;  %v564_v13 = vpack.c.bf16 %v80_v12, %v79_v11  ;;  %v567_v16 = vpack.c.bf16 %v82_v15, %v81_v14  ;;  %v83_v17 = vld [vmem:[#allocation5 + $0x50] sm:$0xff]  ;;  %v84_v18 = vld [vmem:[#allocation5 + $0x58] sm:$0xff]  ;;  %v85_v20 = vld [vmem:[#allocation5 + $0x60] sm:$0xff]  ;;  %vm208_vm1 = vcmp.lt.s32.totalorder %v207_v54, 64 }
  0x3b   :  { %557 = vmatprep.subr.bf16.mxu0 %v720_v0  ;;  %v570_v19 = vpack.c.bf16 %v84_v18, %v83_v17  ;;  %v86_v21 = vld [vmem:[#allocation5 + $0x68] sm:$0xff]  ;;  %v87_v23 = vld [vmem:[#allocation5 + $0x70] sm:$0xff]  ;;  %v88_v24 = vld [vmem:[#allocation5 + $0x78] sm:$0xff] }
  0x3c   :  { %v573_v22 = vpack.c.bf16 %v86_v21, %v85_v20  ;;  %v576_v25 = vpack.c.bf16 %v88_v24, %v87_v23  ;;  %v68_v26 = vld [vmem:[#allocation2] sm:$0xff]  ;;  %v69_v27 = vld [vmem:[#allocation2 + $0x8] sm:$0xff]  ;;  %v70_v28 = vld [vmem:[#allocation2 + $0x10] sm:$0xff] }
  0x3d   :  { %v71_v29 = vld [vmem:[#allocation2 + $0x18] sm:$0xff]  ;;  %v72_v30 = vld [vmem:[#allocation2 + $0x20] sm:$0xff]  ;;  %v278_v47 = vld [vmem:[#allocation7] sm:$0xff] }
  0x3e   :  { %559 = vmatpush3.bf16.msra.mxu0 %v558_v7  ;;  %v414_v31 = vld [vmem:[%s906_s2] ss:$0 sm:$0xff]  ;;  %v279_v48 = vld [vmem:[#allocation7 + $0x8] sm:$0xff]  ;;  %v280_v49 = vld [vmem:[#allocation7 + $0x10] sm:$0xff] }
  0x3f   :  { %560 = vmatprep.subr.bf16.mxu0 %v720_v0  ;;  %v579_v50 = vpack.c.bf16 %v279_v48, %v278_v47  ;;  %v281_v51 = vld [vmem:[#allocation7 + $0x18] sm:$0xff]  ;;  %v283_v17 = vld [vmem:[#allocation7 + $0x28] sm:$0xff]  ;;  %v284_v21 = vld [vmem:[#allocation7 + $0x30] sm:$0xff] }
  0x40   :  { %v582_v52 = vpack.c.bf16 %v281_v51, %v280_v49  ;;  %v286_v24 = vld [vmem:[#allocation7 + $0x40] sm:$0xff]  ;;  %v415_v48 = vld [vmem:[%s907_s3] ss:$0 sm:$0xff] }
  0x41   :  { %580 = vmatpush3.bf16.msra.mxu1 %v579_v50 }
  0x42   :  { %562 = vmatpush3.bf16.msra.mxu0 %v561_v10  ;;  %581 = vmatprep.subr.bf16.mxu1 %v720_v0 }
  0x43   :  { %563 = vmatprep.subr.bf16.mxu0 %v720_v0 }
  0x45   :  { %583 = vmatpush3.bf16.msra.mxu1 %v582_v52  ;;  %v416_v52 = vld [vmem:[%s908_s4] ss:$0 sm:$0xff] }
  0x46   :  { %565 = vmatpush3.bf16.msra.mxu0 %v564_v13  ;;  %584 = vmatprep.subr.bf16.mxu1 %v720_v0 }
  0x47   :  { %566 = vmatprep.subr.bf16.mxu0 %v720_v0 }
  0x4a   :  { %568 = vmatpush3.bf16.msra.mxu0 %v567_v16  ;;  %v282_v16 = vld [vmem:[#allocation7 + $0x20] sm:$0xff] }
  0x4b   :  { %569 = vmatprep.subr.bf16.mxu0 %v720_v0  ;;  %v585_v18 = vpack.c.bf16 %v283_v17, %v282_v16  ;;  %v417_v16 = vld [vmem:[%s910_s6] ss:$0 sm:$0xff]  ;;  %s687_s6 = scalar_lea.vmem %s402_s21, 640 }
  0x4c   :  { %p688_p10 = scmp.ne.s32.totalorder %s402_s21, %s687_s6  ;;  %p693_p12 = scmp.lt.s32.totalorder %s687_s6, %s687_s6 }
  0x4d   :  { %586 = vmatpush3.bf16.msra.mxu1 %v585_v18 }
  0x4e   :  { %571 = vmatpush3.bf16.msra.mxu0 %v570_v19  ;;  %587 = vmatprep.subr.bf16.mxu1 %v720_v0  ;;  %p694_p13 = por %p693_p12, %p692_p11 }
  0x4f   :  { %572 = vmatprep.subr.bf16.mxu0 %v720_v0 }
  0x50   :  { %p695_p0 = pnand %p694_p13, %p688_p10 }
  0x52   :  { %574 = vmatpush3.bf16.msra.mxu0 %v573_v22  ;;  %v285_v22 = vld [vmem:[#allocation7 + $0x38] sm:$0xff] }
  0x53   :  { %575 = vmatprep.subr.bf16.mxu0 %v720_v0  ;;  %v588_v23 = vpack.c.bf16 %v285_v22, %v284_v21 }
  0x55   :  { %589 = vmatpush3.bf16.msra.mxu1 %v588_v23 }
  0x56   :  { %577 = vmatpush3.bf16.msra.mxu0 %v576_v25  ;;  %590 = vmatprep.subr.bf16.mxu1 %v720_v0  ;;  %v287_v25 = vld [vmem:[#allocation7 + $0x48] sm:$0xff] }
  0x59   :  { %493 = vmatmul.mubr.f32.vlgmr.msra.gmra.mrb[0].mxu0 %v68_v26  ;;  %v591_v26 = vpack.c.bf16 %v287_v25, %v286_v24 }
  0x5a   :  { %495 = vmatprep.mubr.msk.f32.mxu0 %vm721_vm0, %v722_v1 }
  0x5b   :  { %592 = vmatpush3.bf16.msra.mxu1 %v591_v26 }
  0x5c   :  { %593 = vmatprep.subr.bf16.mxu1 %v720_v0 }
  0x5d   :  { %496 = vmatmul.mubr.f32.gmra.mrb[2].mxu0 %v69_v27  ;;  %v288_v27 = vld [vmem:[#allocation7 + $0x50] sm:$0xff] }
  0x5e   :  { %498 = vmatprep.mubr.msk.f32.mxu0 %vm721_vm0, %v722_v1 }
  0x61   :  { %499 = vmatmul.mubr.f32.gmra.mrb[4].mxu0 %v70_v28  ;;  %v289_v28 = vld [vmem:[#allocation7 + $0x58] sm:$0xff] }
  0x62   :  { %501 = vmatprep.mubr.msk.f32.mxu0 %vm721_vm0, %v722_v1 }
  0x65   :  { %502 = vmatmul.mubr.f32.gmra.mrb[6].mxu0 %v71_v29  ;;  %v594_v29 = vpack.c.bf16 %v289_v28, %v288_v27 }
  0x66   :  { %504 = vmatprep.mubr.msk.f32.mxu0 %vm721_vm0, %v722_v1 }
  0x67   :  { %595 = vmatpush3.bf16.msra.mxu1 %v594_v29 }
  0x68   :  { %596 = vmatprep.subr.bf16.mxu1 %v720_v0 }
  0x69   :  { %505 = vmatmul.mubr.f32.gmra.mrb[8].mxu0 %v72_v30  ;;  %v290_v30 = vld [vmem:[#allocation7 + $0x60] sm:$0xff] }
 0x12c   :  { %v162_v32 = vpop.f32.mrb[0].mxu0 }
 0x12d   :  { %v163_v33 = vadd.f32 %v414_v31, %v162_v32  ;;  %v494_v34 = vpop.f32.mrb[1].mxu0 }
 0x12e   :  { %v293_v34 = vld [vmem:[#allocation7 + $0x78] sm:$0xff] }
 0x12f   :  { %186 = vadd.xlane.f32.xlu0 %v163_v33 }
 0x130   :  { %v167_v35 = vpop.f32.mrb[2].mxu0 }
 0x131   :  { %v168_v36 = vadd.f32 %v414_v31, %v167_v35  ;;  %v497_v37 = vpop.f32.mrb[3].mxu0 }
 0x133   :  { %188 = vadd.xlane.f32.xlu0 %v168_v36 }
 0x134   :  { %v172_v38 = vpop.f32.mrb[4].mxu0 }
 0x135   :  { %v173_v39 = vadd.f32 %v414_v31, %v172_v38  ;;  %v500_v40 = vpop.f32.mrb[5].mxu0 }
 0x137   :  { %190 = vadd.xlane.f32.xlu1 %v173_v39 }
 0x138   :  { %v177_v41 = vpop.f32.mrb[6].mxu0 }
 0x139   :  { %v178_v42 = vadd.f32 %v414_v31, %v177_v41  ;;  %v503_v43 = vpop.f32.mrb[7].mxu0 }
 0x13b   :  { %192 = vadd.xlane.f32.xlu1 %v178_v42 }
 0x13c   :  { %v182_v44 = vpop.f32.mrb[8].mxu0 }
 0x13d   :  { %v183_v45 = vadd.f32 %v414_v31, %v182_v44  ;;  %v506_v46 = vpop.f32.mrb[9].mxu0  ;;  %v291_v31 = vld [vmem:[#allocation7 + $0x68] sm:$0xff] }
 0x13e   :  { %v597_v32 = vpack.c.bf16 %v291_v31, %v290_v30 }
 0x13f   :  { %194 = vadd.xlane.f32.xlu0 %v183_v45 }
 0x140   :  { %598 = vmatpush3.bf16.msra.mxu1 %v597_v32 }
 0x141   :  { %599 = vmatprep.subr.bf16.mxu1 %v720_v0 }
 0x1bc   :  { %v187_v55 = vpop.xlane.xlu0 %186 }
 0x1bd   :  { %v196_v56 = vmul.f32 0.015625, %v187_v55 }
 0x1bf   :  { %v842_v57 = vsub.f32 %v163_v33, %v196_v56  ;;  %v292_v33 = vld [vmem:[#allocation7 + $0x70] sm:$0xff] }
 0x1c0   :  { %v189_v58 = vpop.xlane.xlu0 %188  ;;  %v600_v35 = vpack.c.bf16 %v293_v34, %v292_v33 }
 0x1c1   :  { %v197_v59 = vmul.f32 0.015625, %v189_v58  ;;  %v209_v60 = vsel %vm208_vm1, %v842_v57, 0.0 }
 0x1c2   :  { %v214_v61 = vmul.f32 %v209_v60, %v209_v60  ;;  %601 = vmatpush3.bf16.msra.mxu1 %v600_v35 }
 0x1c3   :  { %v846_v62 = vsub.f32 %v168_v36, %v197_v59 }
 0x1c4   :  { %v191_v63 = vpop.xlane.xlu1 %190  ;;  %219 = vadd.xlane.f32.xlu1 %v214_v61 }
 0x1c5   :  { %v198_v2 = vmul.f32 0.015625, %v191_v63  ;;  %v210_v3 = vsel %vm208_vm1, %v846_v62, 0.0 }
 0x1c6   :  { %v215_v4 = vmul.f32 %v210_v3, %v210_v3 }
 0x1c7   :  { %v850_v5 = vsub.f32 %v173_v39, %v198_v2 }
 0x1c8   :  { %v193_v6 = vpop.xlane.xlu1 %192  ;;  %221 = vadd.xlane.f32.xlu0 %v215_v4 }
 0x1c9   :  { %v199_v7 = vmul.f32 0.015625, %v193_v6  ;;  %v211_v8 = vsel %vm208_vm1, %v850_v5, 0.0 }
 0x1ca   :  { %v216_v9 = vmul.f32 %v211_v8, %v211_v8 }
 0x1cb   :  { %v854_v10 = vsub.f32 %v178_v42, %v199_v7 }
 0x1cc   :  { %223 = vadd.xlane.f32.xlu1 %v216_v9  ;;  %v195_v11 = vpop.xlane.xlu0 %194 }
 0x1cd   :  { %v200_v12 = vmul.f32 0.015625, %v195_v11  ;;  %v212_v13 = vsel %vm208_vm1, %v854_v10, 0.0 }
 0x1ce   :  { %v217_v14 = vmul.f32 %v212_v13, %v212_v13 }
 0x1cf   :  { %v858_v15 = vsub.f32 %v183_v45, %v200_v12 }
 0x1d0   :  { %225 = vadd.xlane.f32.xlu0 %v217_v14 }
 0x1d1   :  { %v213_v19 = vsel %vm208_vm1, %v858_v15, 0.0 }
 0x1d2   :  { %v218_v20 = vmul.f32 %v213_v19, %v213_v19 }
 0x1d4   :  { %227 = vadd.xlane.f32.xlu1 %v218_v20 }
 0x251   :  { %v220_v36 = vpop.xlane.xlu1 %219 }
 0x252   :  { %v229_v37 = vmul.f32 0.015625, %v220_v36 }
 0x254   :  { %v234_v38 = vadd.f32 1e-05, %v229_v37 }
 0x255   :  { %v222_v39 = vpop.xlane.xlu0 %221 }
 0x256   :  { %611 = vrsqrt.f32 %v234_v38  ;;  %v230_v40 = vmul.f32 0.015625, %v222_v39 }
 0x258   :  { %v235_v41 = vadd.f32 1e-05, %v230_v40 }
 0x259   :  { %v224_v42 = vpop.xlane.xlu1 %223 }
 0x25a   :  { %613 = vrsqrt.f32 %v235_v41  ;;  %v231_v43 = vmul.f32 0.015625, %v224_v42 }
 0x25c   :  { %v236_v44 = vadd.f32 1e-05, %v231_v43 }
 0x25d   :  { %v226_v45 = vpop.xlane.xlu0 %225 }
 0x25e   :  { %615 = vrsqrt.f32 %v236_v44  ;;  %v232_v46 = vmul.f32 0.015625, %v226_v45 }
 0x260   :  { %v612_v47 = vpop.eup %611  ;;  %v237_v0 = vadd.f32 1e-05, %v232_v46 }
 0x261   :  { %v228_v49 = vpop.xlane.xlu1 %227  ;;  %v244_v50 = vmul.f32 %v612_v47, %v842_v57 }
 0x262   :  { %617 = vrsqrt.f32 %v237_v0  ;;  %v233_v51 = vmul.f32 0.015625, %v228_v49 }
 0x263   :  { %v256_v53 = vmul.f32 %v415_v48, %v244_v50 }
 0x264   :  { %v614_v54 = vpop.eup %613  ;;  %v238_v55 = vadd.f32 1e-05, %v233_v51 }
 0x265   :  { %v268_v56 = vadd.f32 %v416_v52, %v256_v53  ;;  %v245_v58 = vmul.f32 %v614_v54, %v846_v62 }
 0x266   :  { %619 = vrsqrt.f32 %v238_v55 }
 0x267   :  { %v273_v59 = vmax.f32 %v268_v56, 0.0  ;;  %v257_v60 = vmul.f32 %v415_v48, %v245_v58 }
 0x268   :  { %v616_v61 = vpop.eup %615 }
 0x269   :  { %540 = vmatmul.mubr.f32.vlgmr.msra.gmra.mrb[0].mxu1 %v273_v59  ;;  %v269_v63 = vadd.f32 %v416_v52, %v257_v60  ;;  %v246_v57 = vmul.f32 %v616_v61, %v850_v5 }
 0x26a   :  { %542 = vmatprep.mubr.msk.f32.mxu1 %vm721_vm0, %v722_v1 }
 0x26b   :  { %v274_v2 = vmax.f32 %v269_v63, 0.0  ;;  %v258_v3 = vmul.f32 %v415_v48, %v246_v57 }
 0x26c   :  { %v618_v4 = vpop.eup %617 }
 0x26d   :  { %543 = vmatmul.mubr.f32.gmra.mrb[2].mxu1 %v274_v2  ;;  %v270_v6 = vadd.f32 %v416_v52, %v258_v3  ;;  %v247_v7 = vmul.f32 %v618_v4, %v854_v10 }
 0x26e   :  { %545 = vmatprep.mubr.msk.f32.mxu1 %vm721_vm0, %v722_v1 }
 0x26f   :  { %v275_v62 = vmax.f32 %v270_v6, 0.0  ;;  %v259_v8 = vmul.f32 %v415_v48, %v247_v7 }
 0x270   :  { %v620_v9 = vpop.eup %619 }
 0x271   :  { %546 = vmatmul.mubr.f32.gmra.mrb[4].mxu1 %v275_v62  ;;  %v271_v11 = vadd.f32 %v416_v52, %v259_v8  ;;  %v248_v5 = vmul.f32 %v620_v9, %v858_v15 }
 0x272   :  { %548 = vmatprep.mubr.msk.f32.mxu1 %vm721_vm0, %v722_v1 }
 0x273   :  { %v276_v12 = vmax.f32 %v271_v11, 0.0  ;;  %v260_v13 = vmul.f32 %v415_v48, %v248_v5 }
 0x275   :  { %549 = vmatmul.mubr.f32.gmra.mrb[6].mxu1 %v276_v12  ;;  %v272_v14 = vadd.f32 %v416_v52, %v260_v13 }
 0x276   :  { %551 = vmatprep.mubr.msk.f32.mxu1 %vm721_vm0, %v722_v1 }
 0x277   :  { %v277_v10 = vmax.f32 %v272_v14, 0.0 }
 0x279   :  { %552 = vmatmul.mubr.f32.gmra.mrb[8].mxu1 %v277_v10 }
 0x33c   :  { %v367_v17 = vpop.f32.mrb[0].mxu1 }
 0x33d   :  { %v368_v18 = vadd.f32 %v417_v16, %v367_v17  ;;  %v541_v19 = vpop.f32.mrb[1].mxu1 }
 0x33f   :  { %391 = vst [vmem:[#allocation8] sm:$0xff] %v368_v18 }
 0x340   :  { %v372_v15 = vpop.f32.mrb[2].mxu1 }
 0x341   :  { %v373_v20 = vadd.f32 %v417_v16, %v372_v15  ;;  %v544_v21 = vpop.f32.mrb[3].mxu1 }
 0x343   :  { %392 = vst [vmem:[#allocation8 + $0x8] sm:$0xff] %v373_v20 }
 0x344   :  { %v377_v22 = vpop.f32.mrb[4].mxu1 }
 0x345   :  { %v378_v23 = vadd.f32 %v417_v16, %v377_v22  ;;  %v547_v24 = vpop.f32.mrb[5].mxu1 }
 0x347   :  { %393 = vst [vmem:[#allocation8 + $0x10] sm:$0xff] %v378_v23 }
 0x348   :  { %v382_v25 = vpop.f32.mrb[6].mxu1 }
 0x349   :  { %v383_v1 = vadd.f32 %v417_v16, %v382_v25  ;;  %v550_v26 = vpop.f32.mrb[7].mxu1 }
 0x34b   :  { %394 = vst [vmem:[#allocation8 + $0x18] sm:$0xff] %v383_v1 }
 0x34c   :  { %v387_v27 = vpop.f32.mrb[8].mxu1 }
 0x34d   :  { %v388_v28 = vadd.f32 %v417_v16, %v387_v27  ;;  %v553_v29 = vpop.f32.mrb[9].mxu1 }
 0x34f   :  { %395 = vst [vmem:[#allocation8 + $0x20] sm:$0xff] %v388_v28 }
 0x350   :  { %698 = shalt.err (!%p695_p0)
}
 0x351   :  { %s699_s24 = scalar_lea.hbm %s911_s7, 640 }
 0x352   :  { %p700_p1 = scmp.ne.s32.totalorder %s911_s7, %s699_s24  ;;  %p703_p2 = scmp.lt.u32.totalorder %s699_s24, %s911_s7 }
 0x354   :  { %p705_p3 = pnand %p703_p2, %p700_p1 }
 0x356   :  { %708 = shalt.err (!%p705_p3)
}
 0x357   :  { %407 = dma.vmem_to_hbm [thread:$0]  %s402_s21, 640, %s911_s7, [#allocation4], %s717_s13, %s717_s13, %s718_s14  }
 0x358   :  { %713 = dma.done.wait [#allocation4], 640  }
 0x359   :  { %714 = vsyncadd [#allocation4], 4294966656 }
 0x35a   :  { %411 = vsyncpa [#allocation3], 1 }
 0x35b   :  { %412 = vsyncpa [#allocation6], 1 }
 0x35c   :  { %413 = vsyncpa [#allocation4], 1 }

</bundles_post_ra>
